<compile_context>
chip_gen: v7x
topology: tpu7x:2x2x1
jax: 0.10.0
libtpu: 0.0.40
codegen_flags: <defaults>
</compile_context>

<pallas_src>
import math

import jax
import jax.numpy as jnp
from jax.experimental import pallas as pl
from jax.experimental.pallas import tpu as pltpu

INPUT_DIM = 1
OUTPUT_DIM = 1

_LANES = 128      # vreg lane width (fast axis)
_SUBLANES = 8     # vreg sublane count (slow axis)
_TM_ROWS = 4096   # rows per streaming tile: 4096*128*4B = 2 MiB
                  # (do not raise past 4096 on v5e without vmem_limit_bytes)


def _scale_bias_kernel(w_ref, b_ref, x_ref, o_ref):
    # Pure VPU path: out = x * w + b ; w, b are SMEM scalars broadcast once.
    w = w_ref[0]
    b = b_ref[0]
    o_ref[...] = x_ref[...] * w + b


def _forward_impl(x, w, b):
    """nn.Linear(1, 1) forward.

    x: [N, 1] float32, w: [1, 1] float32 (PyTorch [out, in] layout),
    b: [1] float32.  Returns [N, 1] float32.
    """
    n = x.shape[0]
    w_s = w.reshape(1).astype(jnp.float32)   # scalar weight -> SMEM
    b_s = b.reshape(1).astype(jnp.float32)   # scalar bias   -> SMEM

    xf = x.reshape(-1).astype(jnp.float32)

    # Lane-dense layout: map the batch axis onto (rows, 128) slabs.
    if n % _LANES == 0 and (n // _LANES) % _SUBLANES == 0:
        # Aligned fast path: no zero-fill, no scatter, no tail slice.
        rows = n // _LANES
        slab = xf.reshape(rows, _LANES)
        padded = False
    else:
        rows = max(_SUBLANES, pl.cdiv(n, _LANES))
        rows = pl.cdiv(rows, _SUBLANES) * _SUBLANES   # rows % 8 == 0 only
        slab = (
            jnp.zeros((rows * _LANES,), jnp.float32)
            .at[:n]
            .set(xf)
            .reshape(rows, _LANES)
        )
        padded = True

    smem_spec = pl.BlockSpec(memory_space=pltpu.MemorySpace.SMEM)
    # Donate the padded slab (a throwaway temporary) as the output buffer.
    alias = {2: 0} if padded else {}

    if rows <= _TM_ROWS:
        # Small/medium batch: no grid, whole slab resident in VMEM — zero
        # per-step pipeline bookkeeping; remaining cost is launch overhead.
        # (<= 2 MiB in + 2 MiB out: fine even for v7x's 64 MiB VMEM.)
        out_slab = pl.pallas_call(
            _scale_bias_kernel,
            out_shape=jax.ShapeDtypeStruct((rows, _LANES), jnp.float32),
            in_specs=[
                smem_spec,
                smem_spec,
                pl.BlockSpec(memory_space=pltpu.MemorySpace.VMEM),
            ],
            out_specs=pl.BlockSpec(memory_space=pltpu.MemorySpace.VMEM),
            input_output_aliases=alias,
        )(w_s, b_s, slab)
    else:
        # Large batch: stream (4096, 128) = 2 MiB tiles; partial last block is
        # handled by Pallas, so no over-padding to a tile multiple.  Batch axis
        # marked "parallel" so it can shard across TensorCores (v7x has 2 TCs).
        out_slab = pl.pallas_call(
            _scale_bias_kernel,
            out_shape=jax.ShapeDtypeStruct((rows, _LANES), jnp.float32),
            grid=(pl.cdiv(rows, _TM_ROWS),),
            in_specs=[
                smem_spec,
                smem_spec,
                pl.BlockSpec((_TM_ROWS, _LANES), lambda i: (i, 0)),
            ],
            out_specs=pl.BlockSpec((_TM_ROWS, _LANES), lambda i: (i, 0)),
            compiler_params=pltpu.CompilerParams(
                dimension_semantics=("parallel",)
            ),
            input_output_aliases=alias,
        )(w_s, b_s, slab)

    if padded:
        return out_slab.reshape(-1)[:n].reshape(n, OUTPUT_DIM)
    return out_slab.reshape(n, OUTPUT_DIM)


# jit so the pad/reshape/pallas_call/slice sequence compiles into one program.
linear_forward = jax.jit(_forward_impl)


def init_params(key, input_dim, output_dim):
    # Deterministic init mimicking nn.Linear: U(-1/sqrt(in), 1/sqrt(in))
    kw, kb = jax.random.split(key)
    bound = 1.0 / math.sqrt(input_dim)
    w = jax.random.uniform(
        kw, (output_dim, input_dim), jnp.float32, minval=-bound, maxval=bound
    )
    b = jax.random.uniform(
        kb, (output_dim,), jnp.float32, minval=-bound, maxval=bound
    )
    return w, b


if __name__ == "__main__":
    key = jax.random.PRNGKey(0)
    kx, kp = jax.random.split(key)
    w, b = init_params(kp, INPUT_DIM, OUTPUT_DIM)

    # Primary small example (batch=8) as the spec's forward implies.
    batch = 8
    x = jax.random.normal(kx, (batch, INPUT_DIM), dtype=jnp.float32)
    out = linear_forward(x, w, b)
    jax.block_until_ready(out)
    ref = x @ w.T + b.reshape(1, OUTPUT_DIM)
    assert out.shape == (batch, OUTPUT_DIM)
    assert jnp.allclose(out, ref, atol=1e-5, rtol=1e-5)

    # Extra branch-coverage checks: aligned no-pad fast path, and the tiled
    # streaming path with a ragged (partial last block) grid.
    for n_extra in (1024, _TM_ROWS * _LANES + 77):
        xe = jax.random.normal(jax.random.PRNGKey(n_extra), (n_extra, INPUT_DIM),
                               dtype=jnp.float32)
        oe = linear_forward(xe, w, b)
        jax.block_until_ready(oe)
        re = xe @ w.T + b.reshape(1, OUTPUT_DIM)
        assert oe.shape == (n_extra, OUTPUT_DIM)
        assert jnp.allclose(oe, re, atol=1e-5, rtol=1e-5)

    print("KERNEL_OK")
</pallas_src>

<mosaic_0001>
module attributes {stable_mosaic.version = 11 : i64} {
  func.func @_scale_bias_kernel(%arg0: memref<1xf32, #tpu.memory_space<smem>>, %arg1: memref<1xf32, #tpu.memory_space<smem>>, %arg2: memref<8x128xf32, #tpu.memory_space<vmem>>, %arg3: memref<8x128xf32, #tpu.memory_space<vmem>>) attributes {dimension_semantics = [], scalar_prefetch = 0 : i64, scratch_operands = 0 : i64, tpu.core_type = #tpu.core_type<tc>} {
    %c0 = arith.constant 0 : index
    %0 = memref.load %arg0[%c0] : memref<1xf32, #tpu.memory_space<smem>>
    %c0_0 = arith.constant 0 : index
    %1 = memref.load %arg1[%c0_0] : memref<1xf32, #tpu.memory_space<smem>>
    %c0_1 = arith.constant 0 : index
    %c0_2 = arith.constant 0 : index
    %2 = vector.load %arg2[%c0_1, %c0_2] : memref<8x128xf32, #tpu.memory_space<vmem>>, vector<8x128xf32>
    %3 = vector.broadcast %0 : f32 to vector<8x128xf32>
    %4 = arith.mulf %2, %3 : vector<8x128xf32>
    %5 = vector.broadcast %1 : f32 to vector<8x128xf32>
    %6 = arith.addf %4, %5 : vector<8x128xf32>
    %c0_3 = arith.constant 0 : index
    %c0_4 = arith.constant 0 : index
    %7 = vector.load %arg3[%c0_3, %c0_4] : memref<8x128xf32, #tpu.memory_space<vmem>>, vector<8x128xf32>
    tpu.vector_store %arg3[%c0_3, %c0_4], %6 {strides = array<i32>} : memref<8x128xf32, #tpu.memory_space<vmem>>, vector<8x128xf32>,
    return
  }
}

</mosaic_0001>

<bundles_post_ra>
// kernel: _forward_impl.1
= control target key start
LH: loop header
LB: loop body
LE: loop exit
PB: predicated region body
PF: predicated region fallthrough
CT: control target
= control target key end

     0   :  { %s60_s0 = inlined_call_operand.<no memory space> [shape: f32[1], index: 0, kind: input, shape index: {}]   ;;  %s61_s1 = inlined_call_operand.<no memory space> [shape: f32[1], index: 1, kind: input, shape index: {}]   ;;  %s62_s2 = inlined_call_operand.vmem [shape: f32[8,128], index: 2, kind: input, shape index: {}, may-alias: {2,3}]   ;;  %s63_s3 = inlined_call_operand.vmem [shape: f32[8,128], index: 3, kind: output, shape index: {}, may-alias: {2,3}]  }
   0x1   :  { %v18_v0 = vld [vmem:[%s62_s2] sm:$0xff]  ;;  %v19_v1 = vstv %s60_s0  ;;  %v21_v2 = vstv %s61_s1 }
   0x2   :  { %v20_v3 = vmul.f32 %v19_v1, %v18_v0 }
   0x4   :  { %v22_v4 = vadd.f32 %v21_v2, %v20_v3 }
   0x6   :  { %23 = vst [vmem:[%s63_s3] sm:$0xff] %v22_v4 }

</bundles_post_ra>
